<compile_context>
chip_gen: v7x
topology: tpu7x:2x2x1
jax: 0.10.0
libtpu: 0.0.40
codegen_flags: <defaults>
</compile_context>

<pallas_src>
import functools

import jax
import jax.numpy as jnp
from jax.experimental import pallas as pl
from jax.experimental.pallas import tpu as pltpu


def _round_up(v, m):
    return ((v + m - 1) // m) * m


def _conv_mm_kernel(w_ref, b_ref, p_ref, o_ref):
    # w_ref: VMEM (O, K) f32   -- conv weight reshaped; columns are vectors
    # b_ref: VMEM (O, 1) f32   -- bias
    # p_ref: VMEM (1, K, TM)   -- K-major im2col patches; lane dim TM is dense
    # o_ref: VMEM (1, O, TM)   -- lane-dense output tile
    num_k = p_ref.shape[1]
    # Per-k rank-1 update of the full (O, TM) tile on the VPU.  With K=12 and
    # O=6 each op uses 6/8 sublanes x 128 lanes (vs 1/8 in the old 1-D form).
    acc = w_ref[:, 0:1] * p_ref[0, 0:1, :]
    for k in range(1, num_k):
        acc = acc + w_ref[:, k:k + 1] * p_ref[0, k:k + 1, :]
    o_ref[0] = (acc + b_ref[...]).astype(o_ref.dtype)


@functools.partial(jax.jit, static_argnames=("stride", "ksize"))
def conv2d_pallas(x, weight, bias, *, stride=2, ksize=2):
    """x: (N, C, H, W) f32; weight: (O, C, kh, kw); bias: (O,). Returns NCHW."""
    N, C, H, W = x.shape
    O = weight.shape[0]
    kh = kw = ksize
    Ho = (H - kh) // stride + 1
    Wo = (W - kw) // stride + 1
    K = C * kh * kw
    Mn = Ho * Wo  # per-image flattened spatial extent

    # stride == kernel, padding 0: drop unused trailing rows/cols (no-op when
    # H, W are multiples of the stride) so the reshape below is exact.
    if H != Ho * stride or W != Wo * stride:
        x = x[:, :, : Ho * stride, : Wo * stride]

    # K-major im2col with k = c*kh*kw + p*kw + q, matching weight.reshape(O,K).
    xp = x.reshape(N, C, Ho, kh, Wo, kw)

    # Small-Mn regime: fold batch into the lane dim so loads/stores are dense
    # across >=128 lanes; otherwise keep per-image layout (no output transpose).
    fold_batch = Mn < 128
    if fold_batch:
        xp = jnp.transpose(xp, (1, 3, 5, 0, 2, 4))        # (C, kh, kw, N, Ho, Wo)
        patches = xp.reshape(1, K, N * Mn)
        Mlane, nb = N * Mn, 1
    else:
        xp = jnp.transpose(xp, (0, 1, 3, 5, 2, 4))        # (N, C, kh, kw, Ho, Wo)
        patches = xp.reshape(N, K, Mn)
        Mlane, nb = Mn, N

    w2d = weight.reshape(O, K).astype(jnp.float32)        # small VMEM block
    b2d = bias.reshape(O, 1).astype(jnp.float32)

    # Lane tile: full extent when it fits, else 8192-lane blocks (multiple of
    # 128; partial last block masked by Pallas).  If the batch axis supplies
    # no parallelism, cap the tile so the lane axis yields >= 2 parallel steps
    # (v7x: shard across both TensorCores).
    max_tm = 8192
    tm = Mlane if Mlane <= max_tm else max_tm
    if nb == 1 and Mlane > 256:
        tm = min(tm, _round_up(pl.cdiv(Mlane, 2), 128))
    mb = pl.cdiv(Mlane, tm)

    out_flat = pl.pallas_call(
        _conv_mm_kernel,
        out_shape=jax.ShapeDtypeStruct((nb, O, Mlane), x.dtype),
        grid_spec=pl.GridSpec(
            grid=(nb, mb),
            in_specs=[
                pl.BlockSpec((O, K), lambda n, m: (0, 0)),         # weight (VMEM)
                pl.BlockSpec((O, 1), lambda n, m: (0, 0)),         # bias   (VMEM)
                pl.BlockSpec((1, K, tm), lambda n, m: (n, 0, m)),  # patches
            ],
            out_specs=pl.BlockSpec((1, O, tm), lambda n, m: (n, 0, m)),
        ),
        compiler_params=pltpu.CompilerParams(
            dimension_semantics=("parallel", "parallel")),
    )(w2d, b2d, patches)

    if fold_batch:
        # (1, O, N*Mn) -> (O, N, Ho, Wo) -> (N, O, Ho, Wo): small output-side
        # transpose (touches <= half the input bytes).
        return jnp.transpose(out_flat.reshape(O, N, Ho, Wo), (1, 0, 2, 3))
    # (N, O, Ho*Wo) -> (N, O, Ho, Wo): free reshape, no transpose.
    return out_flat.reshape(N, O, Ho, Wo)


def _reference_conv(x, weight, bias, stride=2):
    out = jax.lax.conv_general_dilated(
        x, weight, window_strides=(stride, stride), padding="VALID",
        dimension_numbers=("NCHW", "OIHW", "NCHW"))
    return out + bias.reshape(1, -1, 1, 1)


if __name__ == "__main__":
    key = jax.random.PRNGKey(0)
    k_x, k_w, k_b = jax.random.split(key, 3)

    # Module: Conv2d(in=3, out=6, k=2, stride=2, pad=0, bias=True)
    N, C, H, W = 2, 3, 16, 16
    O, kh, kw = 6, 2, 2

    x = jax.random.normal(k_x, (N, C, H, W), dtype=jnp.float32)
    fan_in = C * kh * kw
    bound = 1.0 / (fan_in ** 0.5)
    weight = jax.random.uniform(k_w, (O, C, kh, kw), jnp.float32, -bound, bound)
    bias = jax.random.uniform(k_b, (O,), jnp.float32, -bound, bound)

    out = conv2d_pallas(x, weight, bias, stride=2, ksize=2)
    out = jax.block_until_ready(out)

    ref = _reference_conv(x, weight, bias, stride=2)
    assert out.shape == (N, O, H // 2, W // 2), out.shape
    max_err = float(jnp.max(jnp.abs(out - ref)))
    assert jnp.allclose(out, ref, atol=1e-5, rtol=1e-5), max_err

    print("KERNEL_OK")
</pallas_src>

<mosaic_0001>
module attributes {stable_mosaic.version = 11 : i64} {
  func.func @_conv_mm_kernel(%arg0: i32, %arg1: i32, %arg2: memref<6x12xf32, #tpu.memory_space<vmem>>, %arg3: memref<6x1xf32, #tpu.memory_space<vmem>>, %arg4: memref<1x12x128xf32, #tpu.memory_space<vmem>>, %arg5: memref<1x6x128xf32, #tpu.memory_space<vmem>>) attributes {dimension_semantics = [#tpu.dimension_semantics<parallel>, #tpu.dimension_semantics<parallel>], iteration_bounds = array<i64: 1, 1>, scalar_prefetch = 0 : i64, scratch_operands = 0 : i64, tpu.core_type = #tpu.core_type<tc>, window_params = [{pipeline_mode = #tpu.pipeline_mode<synchronous>, transform_indices = @transform_0, window_bounds = array<i64: 6, 12>}, {pipeline_mode = #tpu.pipeline_mode<synchronous>, transform_indices = @transform_1, window_bounds = array<i64: 6, 1>}, {transform_indices = @transform_2, window_bounds = array<i64: 1, 12, 128>}, {transform_indices = @transform_3, window_bounds = array<i64: 1, 6, 128>}]} {
    %c0 = arith.constant 0 : index
    %c0_0 = arith.constant 0 : index
    %0 = vector.load %arg2[%c0, %c0_0] : memref<6x12xf32, #tpu.memory_space<vmem>>, vector<6x1xf32>
    %c0_1 = arith.constant 0 : index
    %c0_2 = arith.constant 0 : index
    %c0_3 = arith.constant 0 : index
    %1 = vector.load %arg4[%c0_1, %c0_2, %c0_3] : memref<1x12x128xf32, #tpu.memory_space<vmem>>, vector<1x1x128xf32>
    %2 = vector.shape_cast %1 : vector<1x1x128xf32> to vector<1x128xf32>
    %3 = vector.broadcast %0 : vector<6x1xf32> to vector<6x128xf32>
    %4 = vector.broadcast %2 : vector<1x128xf32> to vector<6x128xf32>
    %5 = arith.mulf %3, %4 : vector<6x128xf32>
    %c0_4 = arith.constant 0 : index
    %c1 = arith.constant 1 : index
    %6 = vector.load %arg2[%c0_4, %c1] : memref<6x12xf32, #tpu.memory_space<vmem>>, vector<6x1xf32>
    %c0_5 = arith.constant 0 : index
    %c1_6 = arith.constant 1 : index
    %c0_7 = arith.constant 0 : index
    %7 = vector.load %arg4[%c0_5, %c1_6, %c0_7] : memref<1x12x128xf32, #tpu.memory_space<vmem>>, vector<1x1x128xf32>
    %8 = vector.shape_cast %7 : vector<1x1x128xf32> to vector<1x128xf32>
    %9 = vector.broadcast %6 : vector<6x1xf32> to vector<6x128xf32>
    %10 = vector.broadcast %8 : vector<1x128xf32> to vector<6x128xf32>
    %11 = arith.mulf %9, %10 : vector<6x128xf32>
    %12 = arith.addf %5, %11 : vector<6x128xf32>
    %c0_8 = arith.constant 0 : index
    %c2 = arith.constant 2 : index
    %13 = vector.load %arg2[%c0_8, %c2] : memref<6x12xf32, #tpu.memory_space<vmem>>, vector<6x1xf32>
    %c0_9 = arith.constant 0 : index
    %c2_10 = arith.constant 2 : index
    %c0_11 = arith.constant 0 : index
    %14 = vector.load %arg4[%c0_9, %c2_10, %c0_11] : memref<1x12x128xf32, #tpu.memory_space<vmem>>, vector<1x1x128xf32>
    %15 = vector.shape_cast %14 : vector<1x1x128xf32> to vector<1x128xf32>
    %16 = vector.broadcast %13 : vector<6x1xf32> to vector<6x128xf32>
    %17 = vector.broadcast %15 : vector<1x128xf32> to vector<6x128xf32>
    %18 = arith.mulf %16, %17 : vector<6x128xf32>
    %19 = arith.addf %12, %18 : vector<6x128xf32>
    %c0_12 = arith.constant 0 : index
    %c3 = arith.constant 3 : index
    %20 = vector.load %arg2[%c0_12, %c3] : memref<6x12xf32, #tpu.memory_space<vmem>>, vector<6x1xf32>
    %c0_13 = arith.constant 0 : index
    %c3_14 = arith.constant 3 : index
    %c0_15 = arith.constant 0 : index
    %21 = vector.load %arg4[%c0_13, %c3_14, %c0_15] : memref<1x12x128xf32, #tpu.memory_space<vmem>>, vector<1x1x128xf32>
    %22 = vector.shape_cast %21 : vector<1x1x128xf32> to vector<1x128xf32>
    %23 = vector.broadcast %20 : vector<6x1xf32> to vector<6x128xf32>
    %24 = vector.broadcast %22 : vector<1x128xf32> to vector<6x128xf32>
    %25 = arith.mulf %23, %24 : vector<6x128xf32>
    %26 = arith.addf %19, %25 : vector<6x128xf32>
    %c0_16 = arith.constant 0 : index
    %c4 = arith.constant 4 : index
    %27 = vector.load %arg2[%c0_16, %c4] : memref<6x12xf32, #tpu.memory_space<vmem>>, vector<6x1xf32>
    %c0_17 = arith.constant 0 : index
    %c4_18 = arith.constant 4 : index
    %c0_19 = arith.constant 0 : index
    %28 = vector.load %arg4[%c0_17, %c4_18, %c0_19] : memref<1x12x128xf32, #tpu.memory_space<vmem>>, vector<1x1x128xf32>
    %29 = vector.shape_cast %28 : vector<1x1x128xf32> to vector<1x128xf32>
    %30 = vector.broadcast %27 : vector<6x1xf32> to vector<6x128xf32>
    %31 = vector.broadcast %29 : vector<1x128xf32> to vector<6x128xf32>
    %32 = arith.mulf %30, %31 : vector<6x128xf32>
    %33 = arith.addf %26, %32 : vector<6x128xf32>
    %c0_20 = arith.constant 0 : index
    %c5 = arith.constant 5 : index
    %34 = vector.load %arg2[%c0_20, %c5] : memref<6x12xf32, #tpu.memory_space<vmem>>, vector<6x1xf32>
    %c0_21 = arith.constant 0 : index
    %c5_22 = arith.constant 5 : index
    %c0_23 = arith.constant 0 : index
    %35 = vector.load %arg4[%c0_21, %c5_22, %c0_23] : memref<1x12x128xf32, #tpu.memory_space<vmem>>, vector<1x1x128xf32>
    %36 = vector.shape_cast %35 : vector<1x1x128xf32> to vector<1x128xf32>
    %37 = vector.broadcast %34 : vector<6x1xf32> to vector<6x128xf32>
    %38 = vector.broadcast %36 : vector<1x128xf32> to vector<6x128xf32>
    %39 = arith.mulf %37, %38 : vector<6x128xf32>
    %40 = arith.addf %33, %39 : vector<6x128xf32>
    %c0_24 = arith.constant 0 : index
    %c6 = arith.constant 6 : index
    %41 = vector.load %arg2[%c0_24, %c6] : memref<6x12xf32, #tpu.memory_space<vmem>>, vector<6x1xf32>
    %c0_25 = arith.constant 0 : index
    %c6_26 = arith.constant 6 : index
    %c0_27 = arith.constant 0 : index
    %42 = vector.load %arg4[%c0_25, %c6_26, %c0_27] : memref<1x12x128xf32, #tpu.memory_space<vmem>>, vector<1x1x128xf32>
    %43 = vector.shape_cast %42 : vector<1x1x128xf32> to vector<1x128xf32>
    %44 = vector.broadcast %41 : vector<6x1xf32> to vector<6x128xf32>
    %45 = vector.broadcast %43 : vector<1x128xf32> to vector<6x128xf32>
    %46 = arith.mulf %44, %45 : vector<6x128xf32>
    %47 = arith.addf %40, %46 : vector<6x128xf32>
    %c0_28 = arith.constant 0 : index
    %c7 = arith.constant 7 : index
    %48 = vector.load %arg2[%c0_28, %c7] : memref<6x12xf32, #tpu.memory_space<vmem>>, vector<6x1xf32>
    %c0_29 = arith.constant 0 : index
    %c7_30 = arith.constant 7 : index
    %c0_31 = arith.constant 0 : index
    %49 = vector.load %arg4[%c0_29, %c7_30, %c0_31] : memref<1x12x128xf32, #tpu.memory_space<vmem>>, vector<1x1x128xf32>
    %50 = vector.shape_cast %49 : vector<1x1x128xf32> to vector<1x128xf32>
    %51 = vector.broadcast %48 : vector<6x1xf32> to vector<6x128xf32>
    %52 = vector.broadcast %50 : vector<1x128xf32> to vector<6x128xf32>
    %53 = arith.mulf %51, %52 : vector<6x128xf32>
    %54 = arith.addf %47, %53 : vector<6x128xf32>
    %c0_32 = arith.constant 0 : index
    %c8 = arith.constant 8 : index
    %55 = vector.load %arg2[%c0_32, %c8] : memref<6x12xf32, #tpu.memory_space<vmem>>, vector<6x1xf32>
    %c0_33 = arith.constant 0 : index
    %c8_34 = arith.constant 8 : index
    %c0_35 = arith.constant 0 : index
    %56 = vector.load %arg4[%c0_33, %c8_34, %c0_35] : memref<1x12x128xf32, #tpu.memory_space<vmem>>, vector<1x1x128xf32>
    %57 = vector.shape_cast %56 : vector<1x1x128xf32> to vector<1x128xf32>
    %58 = vector.broadcast %55 : vector<6x1xf32> to vector<6x128xf32>
    %59 = vector.broadcast %57 : vector<1x128xf32> to vector<6x128xf32>
    %60 = arith.mulf %58, %59 : vector<6x128xf32>
    %61 = arith.addf %54, %60 : vector<6x128xf32>
    %c0_36 = arith.constant 0 : index
    %c9 = arith.constant 9 : index
    %62 = vector.load %arg2[%c0_36, %c9] : memref<6x12xf32, #tpu.memory_space<vmem>>, vector<6x1xf32>
    %c0_37 = arith.constant 0 : index
    %c9_38 = arith.constant 9 : index
    %c0_39 = arith.constant 0 : index
    %63 = vector.load %arg4[%c0_37, %c9_38, %c0_39] : memref<1x12x128xf32, #tpu.memory_space<vmem>>, vector<1x1x128xf32>
    %64 = vector.shape_cast %63 : vector<1x1x128xf32> to vector<1x128xf32>
    %65 = vector.broadcast %62 : vector<6x1xf32> to vector<6x128xf32>
    %66 = vector.broadcast %64 : vector<1x128xf32> to vector<6x128xf32>
    %67 = arith.mulf %65, %66 : vector<6x128xf32>
    %68 = arith.addf %61, %67 : vector<6x128xf32>
    %c0_40 = arith.constant 0 : index
    %c10 = arith.constant 10 : index
    %69 = vector.load %arg2[%c0_40, %c10] : memref<6x12xf32, #tpu.memory_space<vmem>>, vector<6x1xf32>
    %c0_41 = arith.constant 0 : index
    %c10_42 = arith.constant 10 : index
    %c0_43 = arith.constant 0 : index
    %70 = vector.load %arg4[%c0_41, %c10_42, %c0_43] : memref<1x12x128xf32, #tpu.memory_space<vmem>>, vector<1x1x128xf32>
    %71 = vector.shape_cast %70 : vector<1x1x128xf32> to vector<1x128xf32>
    %72 = vector.broadcast %69 : vector<6x1xf32> to vector<6x128xf32>
    %73 = vector.broadcast %71 : vector<1x128xf32> to vector<6x128xf32>
    %74 = arith.mulf %72, %73 : vector<6x128xf32>
    %75 = arith.addf %68, %74 : vector<6x128xf32>
    %c0_44 = arith.constant 0 : index
    %c11 = arith.constant 11 : index
    %76 = vector.load %arg2[%c0_44, %c11] : memref<6x12xf32, #tpu.memory_space<vmem>>, vector<6x1xf32>
    %c0_45 = arith.constant 0 : index
    %c11_46 = arith.constant 11 : index
    %c0_47 = arith.constant 0 : index
    %77 = vector.load %arg4[%c0_45, %c11_46, %c0_47] : memref<1x12x128xf32, #tpu.memory_space<vmem>>, vector<1x1x128xf32>
    %78 = vector.shape_cast %77 : vector<1x1x128xf32> to vector<1x128xf32>
    %79 = vector.broadcast %76 : vector<6x1xf32> to vector<6x128xf32>
    %80 = vector.broadcast %78 : vector<1x128xf32> to vector<6x128xf32>
    %81 = arith.mulf %79, %80 : vector<6x128xf32>
    %82 = arith.addf %75, %81 : vector<6x128xf32>
    %c0_48 = arith.constant 0 : index
    %c0_49 = arith.constant 0 : index
    %83 = vector.load %arg3[%c0_48, %c0_49] : memref<6x1xf32, #tpu.memory_space<vmem>>, vector<6x1xf32>
    %84 = vector.broadcast %83 : vector<6x1xf32> to vector<6x128xf32>
    %85 = arith.addf %82, %84 : vector<6x128xf32>
    %c0_50 = arith.constant 0 : index
    %c0_51 = arith.constant 0 : index
    %c0_52 = arith.constant 0 : index
    %86 = vector.load %arg5[%c0_50, %c0_51, %c0_52] : memref<1x6x128xf32, #tpu.memory_space<vmem>>, vector<1x6x128xf32>
    %87 = vector.shape_cast %86 : vector<1x6x128xf32> to vector<6x128xf32>
    %88 = vector.shape_cast %85 : vector<6x128xf32> to vector<1x6x128xf32>
    tpu.vector_store %arg5[%c0_50, %c0_51, %c0_52], %88 {strides = array<i32>} : memref<1x6x128xf32, #tpu.memory_space<vmem>>, vector<1x6x128xf32>,
    return
  }
  func.func @transform_0(%arg0: i32, %arg1: i32) -> (i32, i32) {
    %c0_i32 = arith.constant 0 : i32
    %c0_i32_0 = arith.constant 0 : i32
    %c0_i32_1 = arith.constant 0 : i32
    return %c0_i32, %c0_i32_0 : i32, i32
  }
  func.func @transform_1(%arg0: i32, %arg1: i32) -> (i32, i32) {
    %c0_i32 = arith.constant 0 : i32
    %c0_i32_0 = arith.constant 0 : i32
    %c0_i32_1 = arith.constant 0 : i32
    return %c0_i32, %c0_i32_0 : i32, i32
  }
  func.func @transform_2(%arg0: i32, %arg1: i32) -> (i32, i32, i32) {
    %c0_i32 = arith.constant 0 : i32
    %c0_i32_0 = arith.constant 0 : i32
    return %arg0, %c0_i32, %arg1 : i32, i32, i32
  }
  func.func @transform_3(%arg0: i32, %arg1: i32) -> (i32, i32, i32) {
    %c0_i32 = arith.constant 0 : i32
    %c0_i32_0 = arith.constant 0 : i32
    return %arg0, %c0_i32, %arg1 : i32, i32, i32
  }
}

</mosaic_0001>

<bundles_post_ra>
// kernel: conv2d_pallas.1
= control target key start
LH: loop header
LB: loop body
LE: loop exit
PB: predicated region body
PF: predicated region fallthrough
CT: control target
= control target key end

     0   :  { %v197_v0 = vmov 2   ;;  %v198_v1 = vmov 0   ;;  %v199_v3 = vmov 3   ;;  %v200_v4 = vmov 1   ;;  %s274_s0 = inlined_call_operand.vmem [shape: f32[6,12], index: 0, kind: input, shape index: {}]   ;;  %s275_s1 = inlined_call_operand.vmem [shape: f32[6,1], index: 1, kind: input, shape index: {}]   ;;  %s276_s2 = inlined_call_operand.vmem [shape: f32[1,12,128], index: 2, kind: input, shape index: {}]   ;;  %s277_s3 = inlined_call_operand.vmem [shape: f32[1,6,128], index: 3, kind: output, shape index: {}]  }
   0x1   :  { %185 = vset.pattern.permute.xlu1 %v197_v0  ;;  %183 = vset.pattern.permute.xlu0 %v198_v1  ;;  %v14_v2 = vld [vmem:[%s274_s0] sm:$0x3f]  ;;  %v201_v5 = vmov 4   ;;  %v202_v6 = vmov 5   ;;  %v203_v7 = vmov 6   ;;  %v204_v8 = vmov 8  }
   0x2   :  { %39 = vperm.xlu1 %185, %v14_v2   ;;  %18 = vperm.xlu0 %183, %v14_v2   ;;  %v205_v9 = vmov 7   ;;  %v206_v10 = vmov 11   ;;  %v207_v11 = vmov 9   ;;  %v208_v12 = vmov 10   ;;  %v147_v13 = vld [vmem:[%s275_s1] sm:$0x3f] }
   0x3   :  { %v159_v16 = vld [vmem:[%s276_s2] ss:$0 sm:$0xff]  ;;  %v160_v17 = vld [vmem:[%s276_s2 + $0x1] ss:$0 sm:$0xff]  ;;  %v161_v19 = vld [vmem:[%s276_s2 + $0x2] ss:$0 sm:$0xff] }
   0x4   :  { %v162_v23 = vld [vmem:[%s276_s2 + $0x3] ss:$0 sm:$0xff]  ;;  %v163_v26 = vld [vmem:[%s276_s2 + $0x4] ss:$0 sm:$0xff]  ;;  %v164_v30 = vld [vmem:[%s276_s2 + $0x5] ss:$0 sm:$0xff] }
   0x5   :  { %v165_v36 = vld [vmem:[%s276_s2 + $0x6] ss:$0 sm:$0xff]  ;;  %v166_v40 = vld [vmem:[%s276_s2 + $0x7] ss:$0 sm:$0xff]  ;;  %v167_v42 = vld [vmem:[%s276_s2 + $0x8] ss:$0 sm:$0xff] }
   0x6   :  { %186 = vset.pattern.permute.xlu1 %v199_v3  ;;  %184 = vset.pattern.permute.xlu0 %v200_v4  ;;  %v168_v48 = vld [vmem:[%s276_s2 + $0x9] ss:$0 sm:$0xff]  ;;  %v169_v52 = vld [vmem:[%s276_s2 + $0xa] ss:$0 sm:$0xff]  ;;  %v170_v53 = vld [vmem:[%s276_s2 + $0xb] ss:$0 sm:$0xff] }
   0x7   :  { %50 = vperm.xlu1 %186, %v14_v2   ;;  %28 = vperm.xlu0 %184, %v14_v2  }
   0xb   :  { %187 = vset.pattern.permute.xlu1 %v201_v5  ;;  %188 = vset.pattern.permute.xlu0 %v202_v6 }
   0xc   :  { %61 = vperm.xlu1 %187, %v14_v2   ;;  %72 = vperm.xlu0 %188, %v14_v2  }
  0x10   :  { %189 = vset.pattern.permute.xlu1 %v203_v7  ;;  %191 = vset.pattern.permute.xlu0 %v204_v8 }
  0x11   :  { %83 = vperm.xlu1 %189, %v14_v2   ;;  %105 = vperm.xlu0 %191, %v14_v2  }
  0x15   :  { %190 = vset.pattern.permute.xlu1 %v205_v9  ;;  %194 = vset.pattern.permute.xlu0 %v206_v10 }
  0x16   :  { %94 = vperm.xlu1 %190, %v14_v2   ;;  %138 = vperm.xlu0 %194, %v14_v2  }
  0x1a   :  { %192 = vset.pattern.permute.xlu1 %v207_v11  ;;  %196 = vset.pattern.permute.xlu0 %v198_v1 }
  0x1b   :  { %116 = vperm.xlu1 %192, %v14_v2  }
  0x1f   :  { %193 = vset.pattern.permute.xlu1 %v208_v12 }
  0x20   :  { %127 = vperm.xlu1 %193, %v14_v2  }
  0x24   :  { %195 = vset.pattern.permute.xlu1 %v198_v1 }
  0x25   :  { %150 = vperm.xlu1 %195, %v147_v13  }
  0x81   :  { %v40_v14 = vpop.permute.xlu1 %39  ;;  %v19_v15 = vpop.permute.xlu0 %18 }
  0x82   :  { %v25_v18 = vmul.f32 %v159_v16, %v19_v15  ;;  %v46_v24 = vmul.f32 %v161_v19, %v40_v14 }
  0x86   :  { %v51_v20 = vpop.permute.xlu1 %50  ;;  %v29_v21 = vpop.permute.xlu0 %28 }
  0x87   :  { %v35_v22 = vmul.f32 %v160_v17, %v29_v21  ;;  %v57_v27 = vmul.f32 %v162_v23, %v51_v20 }
  0x89   :  { %v36_v25 = vadd.f32 %v35_v22, %v25_v18 }
  0x8b   :  { %v47_v28 = vadd.f32 %v46_v24, %v36_v25  ;;  %v62_v29 = vpop.permute.xlu1 %61  ;;  %v73_v31 = vpop.permute.xlu0 %72 }
  0x8c   :  { %v68_v32 = vmul.f32 %v163_v26, %v62_v29  ;;  %v79_v34 = vmul.f32 %v164_v30, %v73_v31 }
  0x8d   :  { %v58_v33 = vadd.f32 %v57_v27, %v47_v28 }
  0x8f   :  { %v69_v35 = vadd.f32 %v68_v32, %v58_v33 }
  0x90   :  { %v84_v37 = vpop.permute.xlu1 %83  ;;  %v106_v43 = vpop.permute.xlu0 %105 }
  0x91   :  { %v80_v38 = vadd.f32 %v79_v34, %v69_v35  ;;  %v90_v39 = vmul.f32 %v165_v36, %v84_v37  ;;  %v112_v47 = vmul.f32 %v167_v42, %v106_v43 }
  0x93   :  { %v91_v44 = vadd.f32 %v90_v39, %v80_v38 }
  0x95   :  { %v95_v41 = vpop.permute.xlu1 %94  ;;  %v139_v54 = vpop.permute.xlu0 %138 }
  0x96   :  { %v101_v45 = vmul.f32 %v166_v40, %v95_v41  ;;  %v145_v58 = vmul.f32 %v170_v53, %v139_v54 }
  0x98   :  { %v102_v46 = vadd.f32 %v101_v45, %v91_v44 }
  0x9a   :  { %v117_v49 = vpop.permute.xlu1 %116  ;;  %v113_v50 = vadd.f32 %v112_v47, %v102_v46 }
  0x9b   :  { %v123_v51 = vmul.f32 %v168_v48, %v117_v49 }
  0x9d   :  { %v124_v56 = vadd.f32 %v123_v51, %v113_v50 }
  0x9f   :  { %v128_v55 = vpop.permute.xlu1 %127 }
  0xa0   :  { %v134_v57 = vmul.f32 %v169_v52, %v128_v55 }
  0xa2   :  { %v135_v59 = vadd.f32 %v134_v57, %v124_v56 }
  0xa4   :  { %v151_v60 = vpop.permute.xlu1 %150  ;;  %v146_v61 = vadd.f32 %v145_v58, %v135_v59 }
  0xa6   :  { %v153_v62 = vadd.f32 %v151_v60, %v146_v61 }
  0xa8   :  { %154 = vst [vmem:[%s277_s3] sm:$0x3f] %v153_v62 }

</bundles_post_ra>
